<compile_context>
chip_gen: v7x
topology: tpu7x:2x2x1
jax: 0.10.0
libtpu: 0.0.40
codegen_flags: <defaults>
</compile_context>

<pallas_src>
import functools

import jax
import jax.numpy as jnp
from jax.experimental import pallas as pl
from jax.experimental.pallas import tpu as pltpu


def _round_up(x, m):
    return (x + m - 1) // m * m


# ---------------------------------------------------------------------------
# Kernels
# ---------------------------------------------------------------------------

def _accumulate_and_store(x_slice, w_ref, b_ref, o_ref, acc_ref, *, context_size, dp):
    """acc = sum_c x_c @ W_c (f32 accumulation), then bias + ReLU + cast + store."""
    for c in range(context_size):                      # small static unroll
        contrib = jnp.dot(x_slice(c), w_ref[c * dp:(c + 1) * dp, :],
                          preferred_element_type=jnp.float32)
        if c == 0:
            acc_ref[...] = contrib                     # no separate zero-init pass
        else:
            acc_ref[...] += contrib
    y = acc_ref[...] + b_ref[...]                      # (1, Op) f32 bias broadcast
    o_ref[0, :, :] = jnp.maximum(y, 0.0).astype(o_ref.dtype)


def _tdnn_resident_kernel(x_ref, w_ref, b_ref, o_ref, acc_ref, *,
                          context_size, dilation, dp, ts):
    # x_ref : (1, Sp, Dp)   whole padded sequence of this batch item (changes only with b)
    # w_ref : (ctx*Dp, Op)  packed weight, constant block -> fetched once per launch
    # b_ref : (1, Op)       f32 bias, constant block
    # o_ref : (1, Ts, Op)   output tile
    # acc_ref: (Ts, Op) f32 accumulator scratch (fully rewritten every grid step,
    #                       so the grid may be fully parallel)
    si = pl.program_id(1)
    s0 = pl.multiple_of(si * ts, ts)

    def x_slice(c):
        return x_ref[0, pl.ds(s0 + c * dilation, ts), :]        # (Ts, Dp)

    _accumulate_and_store(x_slice, w_ref, b_ref, o_ref, acc_ref,
                          context_size=context_size, dp=dp)


def _tdnn_streamed_kernel(x_hbm, w_ref, b_ref, o_ref, xwin, sem, acc_ref, *,
                          context_size, dilation, dp, ts, twin, n_s):
    # x_hbm : (B, Sp, Dp) in HBM; a haloed (Twin, Dp) window is DMA'd per seq tile.
    # xwin  : (2, Twin, Dp) VMEM double buffer; sem: (2,) DMA semaphores.
    # NOTE: the cross-step window prefetch requires the si axis to be sequential
    # ("arbitrary"); only the batch axis is megacore-parallel in this mode.
    b = pl.program_id(0)
    si = pl.program_id(1)
    slot = si % 2

    def window_copy(s_idx, dst_slot):
        return pltpu.make_async_copy(
            x_hbm.at[b, pl.ds(s_idx * ts, twin), :],
            xwin.at[dst_slot],
            sem.at[dst_slot])

    @pl.when(si == 0)                      # first tile of this batch item: fetch now
    def _():
        window_copy(si, slot).start()

    window_copy(si, slot).wait()

    @pl.when(si + 1 < n_s)                 # prefetch next tile of the SAME batch item
    def _():
        window_copy(si + 1, 1 - slot).start()

    win = xwin.at[slot]

    def x_slice(c):
        return win[pl.ds(c * dilation, ts), :]                  # (Ts, Dp)

    _accumulate_and_store(x_slice, w_ref, b_ref, o_ref, acc_ref,
                          context_size=context_size, dp=dp)


# ---------------------------------------------------------------------------
# Host-side wrappers
# ---------------------------------------------------------------------------

def pack_tdnn_params(weight, bias, *, input_dim, context_size,
                     compute_dtype=jnp.bfloat16):
    """Pack the (output_dim, ctx*D) Linear weight into a lane-padded (ctx*Dp, Op) slab
    and the bias into (1, Op) f32.  Do this ONCE at parameter-load time."""
    output_dim = weight.shape[0]
    D = input_dim
    assert weight.shape == (output_dim, context_size * D)
    Dp = _round_up(D, 128)
    Op = _round_up(output_dim, 128)
    # (out, ctx*D) -> (ctx, D, out); zero-pad each context slab to (Dp, Op); flatten so
    # weight row c*Dp + d multiplies lane d of context frame c.
    w3 = weight.reshape(output_dim, context_size, D).transpose(1, 2, 0)
    wp = jnp.zeros((context_size, Dp, Op), compute_dtype)
    wp = wp.at[:, :D, :output_dim].set(w3.astype(compute_dtype))
    wp = wp.reshape(context_size * Dp, Op)
    bp = jnp.zeros((1, Op), jnp.float32).at[0, :output_dim].set(bias.astype(jnp.float32))
    return wp, bp


def tdnn_forward_packed(x, wp, bp, *, context_size, dilation, output_dim,
                        compute_dtype=jnp.bfloat16, out_dtype=jnp.float32,
                        seq_tile=512, x_placement="auto",
                        resident_x_budget_bytes=12 << 20):
    """x: (B, S, D); wp/bp from pack_tdnn_params with the same compute_dtype."""
    B, S, D = x.shape
    halo = dilation * (context_size - 1)
    new_S = S - halo
    assert new_S > 0, "seq_len too short for context_size/dilation"

    Dp = _round_up(D, 128)
    Op = _round_up(output_dim, 128)
    CK = context_size * Dp
    assert wp.shape == (CK, Op) and bp.shape == (1, Op), "params not packed for this shape"

    csize = jnp.dtype(compute_dtype).itemsize
    osize = jnp.dtype(out_dtype).itemsize

    Ts = min(_round_up(seq_tile, 8), _round_up(new_S, 8))      # sublane-aligned seq tile
    new_Sp = _round_up(new_S, Ts)
    halo_pad = _round_up(halo, 8)
    Sp = new_Sp + halo_pad                                     # padded input rows
    Twin = Ts + halo_pad                                       # haloed window rows
    n_s = new_Sp // Ts

    # Pad / convert x once (zero lanes D..Dp hit zero weight rows, zero tail rows are
    # sliced off).  TODO(synk): when D is already lane-aligned the ragged tail could be
    # handled in-kernel to avoid this extra HBM round-trip.
    if D == Dp and S == Sp and x.dtype == compute_dtype:
        xp = x
    else:
        xp = jnp.zeros((B, Sp, Dp), compute_dtype).at[:, :S, :D].set(x.astype(compute_dtype))

    # VMEM footprint (double-buffered pipeline blocks + scratch).
    bytes_w = 2 * CK * Op * csize
    bytes_b = 2 * Op * 4
    bytes_out = 2 * Ts * Op * osize
    bytes_acc = Ts * Op * 4
    bytes_x_res = 2 * Sp * Dp * csize
    bytes_x_str = 2 * Twin * Dp * csize

    if x_placement == "auto":
        use_resident = bytes_x_res <= resident_x_budget_bytes
    elif x_placement == "resident":
        use_resident = True
    elif x_placement == "streamed":
        use_resident = False
    else:
        raise ValueError("x_placement must be 'auto', 'resident' or 'streamed'")

    # Constant (launch-resident) weight / bias blocks: DMA'd once per kernel launch.
    w_spec = pl.BlockSpec((CK, Op), lambda b, si: (0, 0))
    b_spec = pl.BlockSpec((1, Op), lambda b, si: (0, 0))
    out_spec = pl.BlockSpec((1, Ts, Op), lambda b, si: (b, si, 0))

    if use_resident:
        in_specs = [pl.BlockSpec((1, Sp, Dp), lambda b, si: (b, 0, 0)), w_spec, b_spec]
        scratch = [pltpu.VMEM((Ts, Op), jnp.float32)]
        kernel = functools.partial(_tdnn_resident_kernel, context_size=context_size,
                                   dilation=dilation, dp=Dp, ts=Ts)
        dims = ("parallel", "parallel")          # megacore can shard batch and seq tiles
        needed = bytes_x_res + bytes_w + bytes_b + bytes_out + bytes_acc
    else:
        in_specs = [pl.BlockSpec(memory_space=pl.ANY), w_spec, b_spec]
        scratch = [pltpu.VMEM((2, Twin, Dp), compute_dtype),
                   pltpu.SemaphoreType.DMA((2,)),
                   pltpu.VMEM((Ts, Op), jnp.float32)]
        kernel = functools.partial(_tdnn_streamed_kernel, context_size=context_size,
                                   dilation=dilation, dp=Dp, ts=Ts, twin=Twin, n_s=n_s)
        dims = ("parallel", "arbitrary")         # si sequential: cross-step window prefetch
        needed = bytes_x_str + bytes_w + bytes_b + bytes_out + bytes_acc

    if needed > (56 << 20):
        raise ValueError("TDNN kernel VMEM footprint too large; use "
                         "x_placement='streamed' and/or a smaller seq_tile.")
    vmem_limit = int(min(64 << 20, 2 * needed + (8 << 20)))

    out = pl.pallas_call(
        kernel,
        out_shape=jax.ShapeDtypeStruct((B, new_Sp, Op), out_dtype),
        grid_spec=pltpu.PrefetchScalarGridSpec(
            num_scalar_prefetch=0,
            grid=(B, n_s),
            in_specs=in_specs,
            out_specs=out_spec,
            scratch_shapes=scratch),
        compiler_params=pltpu.CompilerParams(
            dimension_semantics=dims,
            vmem_limit_bytes=vmem_limit),
    )(xp, wp, bp)

    if new_Sp == new_S and Op == output_dim:
        return out
    return out[:, :new_S, :output_dim]


def tdnn_forward(x, weight, bias, *, context_size, dilation, **kw):
    """Convenience wrapper (re-packs params every call; prefer pack_tdnn_params once)."""
    compute_dtype = kw.get("compute_dtype", jnp.bfloat16)
    wp, bp = pack_tdnn_params(weight, bias, input_dim=x.shape[-1],
                              context_size=context_size, compute_dtype=compute_dtype)
    return tdnn_forward_packed(x, wp, bp, context_size=context_size, dilation=dilation,
                               output_dim=weight.shape[0], **kw)


def tdnn_reference(x, weight, bias, *, context_size, dilation):
    """Pure-JAX f32 reference matching the PyTorch forward (eval mode)."""
    B, S, D = x.shape
    new_S = S - dilation * (context_size - 1)
    windows = [x[:, c * dilation:c * dilation + new_S, :] for c in range(context_size)]
    xw = jnp.concatenate(windows, axis=-1)                 # (B, new_S, ctx*D)
    y = jnp.einsum('bsc,oc->bso', xw, weight) + bias[None, None, :]
    return jnp.maximum(y, 0.0)


if __name__ == "__main__":
    batch, seq_len, input_dim = 2, 16, 16
    output_dim, context_size, dilation = 32, 5, 1

    key = jax.random.PRNGKey(0)
    kx, kw_, kb = jax.random.split(key, 3)
    x = jax.random.normal(kx, (batch, seq_len, input_dim), dtype=jnp.float32)
    fan_in = input_dim * context_size
    bound = 1.0 / (fan_in ** 0.5)
    weight = jax.random.uniform(kw_, (output_dim, fan_in), jnp.float32, -bound, bound)
    bias = jax.random.uniform(kb, (output_dim,), jnp.float32, -bound, bound)

    new_seq = seq_len - dilation * (context_size - 1)
    ref = tdnn_reference(x, weight, bias, context_size=context_size, dilation=dilation)

    # Pack params once per dtype (parameter-load-time cost, not per forward call).
    wp32, bp32 = pack_tdnn_params(weight, bias, input_dim=input_dim,
                                  context_size=context_size, compute_dtype=jnp.float32)
    wp16, bp16 = pack_tdnn_params(weight, bias, input_dim=input_dim,
                                  context_size=context_size, compute_dtype=jnp.bfloat16)

    # 1) f32 operands, VMEM-resident sequence path: tight check.
    out = jax.block_until_ready(tdnn_forward_packed(
        x, wp32, bp32, context_size=context_size, dilation=dilation,
        output_dim=output_dim, compute_dtype=jnp.float32))
    assert out.shape == (batch, new_seq, output_dim)
    assert jnp.allclose(out, ref, atol=1e-5, rtol=1e-5), "f32 resident mismatch"

    # 2) f32 operands, streamed (manual haloed-window DMA) path: tight check.
    out = jax.block_until_ready(tdnn_forward_packed(
        x, wp32, bp32, context_size=context_size, dilation=dilation,
        output_dim=output_dim, compute_dtype=jnp.float32, x_placement="streamed"))
    assert out.shape == (batch, new_seq, output_dim)
    assert jnp.allclose(out, ref, atol=1e-5, rtol=1e-5), "f32 streamed mismatch"

    # 3) bf16 operands with f32 accumulation (default MXU fast path): loose check.
    out = jax.block_until_ready(tdnn_forward_packed(
        x, wp16, bp16, context_size=context_size, dilation=dilation,
        output_dim=output_dim, compute_dtype=jnp.bfloat16))
    assert out.shape == (batch, new_seq, output_dim)
    assert jnp.allclose(out, ref, atol=3e-2, rtol=3e-2), "bf16 resident mismatch"

    # 4) bf16 operands + bf16 output (halves output writeback): loose check.
    out = jax.block_until_ready(tdnn_forward_packed(
        x, wp16, bp16, context_size=context_size, dilation=dilation,
        output_dim=output_dim, compute_dtype=jnp.bfloat16, out_dtype=jnp.bfloat16))
    assert out.dtype == jnp.bfloat16 and out.shape == (batch, new_seq, output_dim)
    assert jnp.allclose(out.astype(jnp.float32), ref, atol=3e-2, rtol=3e-2), "bf16-out mismatch"

    print("KERNEL_OK")
</pallas_src>

<mosaic_0001>
module attributes {stable_mosaic.version = 11 : i64} {
  func.func @_tdnn_resident_kernel(%arg0: i32, %arg1: i32, %arg2: memref<1x24x128xf32, #tpu.memory_space<vmem>>, %arg3: memref<640x128xf32, #tpu.memory_space<vmem>>, %arg4: memref<1x128xf32, #tpu.memory_space<vmem>>, %arg5: memref<1x16x128xf32, #tpu.memory_space<vmem>>, %arg6: memref<16x128xf32, #tpu.memory_space<vmem>>) attributes {dimension_semantics = [#tpu.dimension_semantics<parallel>, #tpu.dimension_semantics<parallel>], iteration_bounds = array<i64: 2, 1>, scalar_prefetch = 0 : i64, scratch_operands = 1 : i64, tpu.core_type = #tpu.core_type<tc>, window_params = [{transform_indices = @transform_0, window_bounds = array<i64: 1, 24, 128>}, {pipeline_mode = #tpu.pipeline_mode<synchronous>, transform_indices = @transform_1, window_bounds = array<i64: 640, 128>}, {pipeline_mode = #tpu.pipeline_mode<synchronous>, transform_indices = @transform_2, window_bounds = array<i64: 1, 128>}, {transform_indices = @transform_3, window_bounds = array<i64: 1, 16, 128>}]} {
    %c16_i32 = arith.constant 16 : i32
    %0 = arith.muli %arg1, %c16_i32 : i32
    %1 = tpu.assume_multiple %0, 16 : i32
    %c0_i32 = arith.constant 0 : i32
    %2 = arith.addi %1, %c0_i32 : i32
    %c0 = arith.constant 0 : index
    %3 = arith.index_cast %2 : i32 to index
    %c0_0 = arith.constant 0 : index
    %4 = vector.load %arg2[%c0, %3, %c0_0] : memref<1x24x128xf32, #tpu.memory_space<vmem>>, vector<1x16x128xf32>
    %5 = vector.shape_cast %4 : vector<1x16x128xf32> to vector<16x128xf32>
    %c0_1 = arith.constant 0 : index
    %c0_2 = arith.constant 0 : index
    %6 = vector.load %arg3[%c0_1, %c0_2] : memref<640x128xf32, #tpu.memory_space<vmem>>, vector<128x128xf32>
    %cst = arith.constant dense<0.000000e+00> : vector<16x128xf32>
    %7 = tpu.matmul %5, %6, %cst {dimension_numbers = #tpu.dot_dimension_numbers<[1], [0], [0], [1], [0, 0, 1, 1], [], []>} : vector<16x128xf32>, vector<128x128xf32>, vector<16x128xf32> -> vector<16x128xf32>
    %c0_3 = arith.constant 0 : index
    %c0_4 = arith.constant 0 : index
    %8 = vector.load %arg6[%c0_3, %c0_4] : memref<16x128xf32, #tpu.memory_space<vmem>>, vector<16x128xf32>
    tpu.vector_store %arg6[%c0_3, %c0_4], %7 {strides = array<i32>} : memref<16x128xf32, #tpu.memory_space<vmem>>, vector<16x128xf32>,
    %c1_i32 = arith.constant 1 : i32
    %9 = arith.addi %1, %c1_i32 : i32
    %c0_5 = arith.constant 0 : index
    %10 = arith.index_cast %9 : i32 to index
    %c0_6 = arith.constant 0 : index
    %11 = vector.load %arg2[%c0_5, %10, %c0_6] : memref<1x24x128xf32, #tpu.memory_space<vmem>>, vector<1x16x128xf32>
    %12 = vector.shape_cast %11 : vector<1x16x128xf32> to vector<16x128xf32>
    %c128 = arith.constant 128 : index
    %c0_7 = arith.constant 0 : index
    %13 = vector.load %arg3[%c128, %c0_7] : memref<640x128xf32, #tpu.memory_space<vmem>>, vector<128x128xf32>
    %cst_8 = arith.constant dense<0.000000e+00> : vector<16x128xf32>
    %14 = tpu.matmul %12, %13, %cst_8 {dimension_numbers = #tpu.dot_dimension_numbers<[1], [0], [0], [1], [0, 0, 1, 1], [], []>} : vector<16x128xf32>, vector<128x128xf32>, vector<16x128xf32> -> vector<16x128xf32>
    %c0_9 = arith.constant 0 : index
    %c0_10 = arith.constant 0 : index
    %15 = vector.load %arg6[%c0_9, %c0_10] : memref<16x128xf32, #tpu.memory_space<vmem>>, vector<16x128xf32>
    %16 = arith.addf %15, %14 : vector<16x128xf32>
    %c0_11 = arith.constant 0 : index
    %c0_12 = arith.constant 0 : index
    %17 = vector.load %arg6[%c0_11, %c0_12] : memref<16x128xf32, #tpu.memory_space<vmem>>, vector<16x128xf32>
    tpu.vector_store %arg6[%c0_11, %c0_12], %16 {strides = array<i32>} : memref<16x128xf32, #tpu.memory_space<vmem>>, vector<16x128xf32>,
    %c2_i32 = arith.constant 2 : i32
    %18 = arith.addi %1, %c2_i32 : i32
    %c0_13 = arith.constant 0 : index
    %19 = arith.index_cast %18 : i32 to index
    %c0_14 = arith.constant 0 : index
    %20 = vector.load %arg2[%c0_13, %19, %c0_14] : memref<1x24x128xf32, #tpu.memory_space<vmem>>, vector<1x16x128xf32>
    %21 = vector.shape_cast %20 : vector<1x16x128xf32> to vector<16x128xf32>
    %c256 = arith.constant 256 : index
    %c0_15 = arith.constant 0 : index
    %22 = vector.load %arg3[%c256, %c0_15] : memref<640x128xf32, #tpu.memory_space<vmem>>, vector<128x128xf32>
    %cst_16 = arith.constant dense<0.000000e+00> : vector<16x128xf32>
    %23 = tpu.matmul %21, %22, %cst_16 {dimension_numbers = #tpu.dot_dimension_numbers<[1], [0], [0], [1], [0, 0, 1, 1], [], []>} : vector<16x128xf32>, vector<128x128xf32>, vector<16x128xf32> -> vector<16x128xf32>
    %c0_17 = arith.constant 0 : index
    %c0_18 = arith.constant 0 : index
    %24 = vector.load %arg6[%c0_17, %c0_18] : memref<16x128xf32, #tpu.memory_space<vmem>>, vector<16x128xf32>
    %25 = arith.addf %24, %23 : vector<16x128xf32>
    %c0_19 = arith.constant 0 : index
    %c0_20 = arith.constant 0 : index
    %26 = vector.load %arg6[%c0_19, %c0_20] : memref<16x128xf32, #tpu.memory_space<vmem>>, vector<16x128xf32>
    tpu.vector_store %arg6[%c0_19, %c0_20], %25 {strides = array<i32>} : memref<16x128xf32, #tpu.memory_space<vmem>>, vector<16x128xf32>,
    %c3_i32 = arith.constant 3 : i32
    %27 = arith.addi %1, %c3_i32 : i32
    %c0_21 = arith.constant 0 : index
    %28 = arith.index_cast %27 : i32 to index
    %c0_22 = arith.constant 0 : index
    %29 = vector.load %arg2[%c0_21, %28, %c0_22] : memref<1x24x128xf32, #tpu.memory_space<vmem>>, vector<1x16x128xf32>
    %30 = vector.shape_cast %29 : vector<1x16x128xf32> to vector<16x128xf32>
    %c384 = arith.constant 384 : index
    %c0_23 = arith.constant 0 : index
    %31 = vector.load %arg3[%c384, %c0_23] : memref<640x128xf32, #tpu.memory_space<vmem>>, vector<128x128xf32>
    %cst_24 = arith.constant dense<0.000000e+00> : vector<16x128xf32>
    %32 = tpu.matmul %30, %31, %cst_24 {dimension_numbers = #tpu.dot_dimension_numbers<[1], [0], [0], [1], [0, 0, 1, 1], [], []>} : vector<16x128xf32>, vector<128x128xf32>, vector<16x128xf32> -> vector<16x128xf32>
    %c0_25 = arith.constant 0 : index
    %c0_26 = arith.constant 0 : index
    %33 = vector.load %arg6[%c0_25, %c0_26] : memref<16x128xf32, #tpu.memory_space<vmem>>, vector<16x128xf32>
    %34 = arith.addf %33, %32 : vector<16x128xf32>
    %c0_27 = arith.constant 0 : index
    %c0_28 = arith.constant 0 : index
    %35 = vector.load %arg6[%c0_27, %c0_28] : memref<16x128xf32, #tpu.memory_space<vmem>>, vector<16x128xf32>
    tpu.vector_store %arg6[%c0_27, %c0_28], %34 {strides = array<i32>} : memref<16x128xf32, #tpu.memory_space<vmem>>, vector<16x128xf32>,
    %c4_i32 = arith.constant 4 : i32
    %36 = arith.addi %1, %c4_i32 : i32
    %c0_29 = arith.constant 0 : index
    %37 = arith.index_cast %36 : i32 to index
    %c0_30 = arith.constant 0 : index
    %38 = vector.load %arg2[%c0_29, %37, %c0_30] : memref<1x24x128xf32, #tpu.memory_space<vmem>>, vector<1x16x128xf32>
    %39 = vector.shape_cast %38 : vector<1x16x128xf32> to vector<16x128xf32>
    %c512 = arith.constant 512 : index
    %c0_31 = arith.constant 0 : index
    %40 = vector.load %arg3[%c512, %c0_31] : memref<640x128xf32, #tpu.memory_space<vmem>>, vector<128x128xf32>
    %cst_32 = arith.constant dense<0.000000e+00> : vector<16x128xf32>
    %41 = tpu.matmul %39, %40, %cst_32 {dimension_numbers = #tpu.dot_dimension_numbers<[1], [0], [0], [1], [0, 0, 1, 1], [], []>} : vector<16x128xf32>, vector<128x128xf32>, vector<16x128xf32> -> vector<16x128xf32>
    %c0_33 = arith.constant 0 : index
    %c0_34 = arith.constant 0 : index
    %42 = vector.load %arg6[%c0_33, %c0_34] : memref<16x128xf32, #tpu.memory_space<vmem>>, vector<16x128xf32>
    %43 = arith.addf %42, %41 : vector<16x128xf32>
    %c0_35 = arith.constant 0 : index
    %c0_36 = arith.constant 0 : index
    %44 = vector.load %arg6[%c0_35, %c0_36] : memref<16x128xf32, #tpu.memory_space<vmem>>, vector<16x128xf32>
    tpu.vector_store %arg6[%c0_35, %c0_36], %43 {strides = array<i32>} : memref<16x128xf32, #tpu.memory_space<vmem>>, vector<16x128xf32>,
    %c0_37 = arith.constant 0 : index
    %c0_38 = arith.constant 0 : index
    %45 = vector.load %arg6[%c0_37, %c0_38] : memref<16x128xf32, #tpu.memory_space<vmem>>, vector<16x128xf32>
    %c0_39 = arith.constant 0 : index
    %c0_40 = arith.constant 0 : index
    %46 = vector.load %arg4[%c0_39, %c0_40] : memref<1x128xf32, #tpu.memory_space<vmem>>, vector<1x128xf32>
    %47 = vector.broadcast %46 : vector<1x128xf32> to vector<16x128xf32>
    %48 = arith.addf %45, %47 : vector<16x128xf32>
    %cst_41 = arith.constant 0.000000e+00 : f32
    %49 = vector.broadcast %cst_41 : f32 to vector<16x128xf32>
    %50 = arith.maximumf %48, %49 : vector<16x128xf32>
    %c0_42 = arith.constant 0 : index
    %c0_43 = arith.constant 0 : index
    %c0_44 = arith.constant 0 : index
    %51 = vector.load %arg5[%c0_42, %c0_43, %c0_44] : memref<1x16x128xf32, #tpu.memory_space<vmem>>, vector<1x16x128xf32>
    %52 = vector.shape_cast %51 : vector<1x16x128xf32> to vector<16x128xf32>
    %53 = vector.shape_cast %50 : vector<16x128xf32> to vector<1x16x128xf32>
    tpu.vector_store %arg5[%c0_42, %c0_43, %c0_44], %53 {strides = array<i32>} : memref<1x16x128xf32, #tpu.memory_space<vmem>>, vector<1x16x128xf32>,
    return
  }
  func.func @transform_0(%arg0: i32, %arg1: i32) -> (i32, i32, i32) {
    %c0_i32 = arith.constant 0 : i32
    %c0_i32_0 = arith.constant 0 : i32
    %c0_i32_1 = arith.constant 0 : i32
    return %arg0, %c0_i32, %c0_i32_0 : i32, i32, i32
  }
  func.func @transform_1(%arg0: i32, %arg1: i32) -> (i32, i32) {
    %c0_i32 = arith.constant 0 : i32
    %c0_i32_0 = arith.constant 0 : i32
    %c0_i32_1 = arith.constant 0 : i32
    return %c0_i32, %c0_i32_0 : i32, i32
  }
  func.func @transform_2(%arg0: i32, %arg1: i32) -> (i32, i32) {
    %c0_i32 = arith.constant 0 : i32
    %c0_i32_0 = arith.constant 0 : i32
    %c0_i32_1 = arith.constant 0 : i32
    return %c0_i32, %c0_i32_0 : i32, i32
  }
  func.func @transform_3(%arg0: i32, %arg1: i32) -> (i32, i32, i32) {
    %c0_i32 = arith.constant 0 : i32
    %c0_i32_0 = arith.constant 0 : i32
    return %arg0, %arg1, %c0_i32 : i32, i32, i32
  }
}

</mosaic_0001>

<bundles_post_ra>
// kernel: tpu_custom_call.1
= control target key start
LH: loop header
LB: loop body
LE: loop exit
PB: predicated region body
PF: predicated region fallthrough
CT: control target
= control target key end

     0   :  { %8 = vsyncpa [#allocation4], 0  ;;  %s1804_s0 = inlined_call_operand.hbm [shape: f32[2,24,128], index: 0, kind: input, shape index: {}]   ;;  %s1805_s1 = inlined_call_operand.hbm [shape: f32[640,128], index: 1, kind: input, shape index: {}]   ;;  %s1806_s2 = inlined_call_operand.vmem [shape: f32[1,128], index: 2, kind: input, shape index: {}]   ;;  %s1807_s3 = inlined_call_operand.hbm [shape: f32[2,16,128], index: 3, kind: output, shape index: {}]  }
   0x1   :  { %10 = vsyncpa [#allocation4 + $0x1], 0 }
   0x2   :  { %11 = vsyncpa [#allocation7], 0 }
   0x3   :  { %12 = vsyncpa [#allocation5], 0 }
   0x4   :  { %14 = vsyncpa [#allocation5 + $0x1], 0  ;;  %s1569_s12 = smov 0   ;;  %s1571_s13 = smov 0  }
   0x5   :  { %s1573_s14 = smov 0   ;;  %s1575_s15 = smov 0  }
   0x6   :  { %s1577_s16 = smov 0   ;;  %s1579_s17 = smov 0  }
   0x7 LB: > { %s859_s18 = sadd.s32 4294967295, %s1540_s17   ;;  %s860_s19 = sadd.s32 4294967294, %s1540_s17   ;;  %s1540_s17 = sphi %s1579_s17, %s20_s17   ;;  %s1536_s16 = sphi %s1577_s16, %s1830_s16   ;;  %s1532_s15 = sphi %s1575_s15, %s1829_s15   ;;  %s1528_s14 = sphi %s1573_s14, %s1828_s14   ;;  %s1524_s13 = sphi %s1571_s13, %s1827_s13   ;;  %s1520_s12 = sphi %s1569_s12, %s1826_s12  }
   0x8   : > { %p52_p0 = scmp.ne.s32.totalorder %s1524_s13, %s1520_s12  ;;  %p1603_p1 = scmp.eq.s32.totalorder %s859_s18, 0 }
   0x9   : > { %p1607_p2 = scmp.eq.s32.totalorder %s859_s18, 1  ;;  %p126_p3 = scmp.eq.s32.totalorder %s860_s19, 1 }
   0xa   : > { %s1812_s20 = scalar_select %p1603_p1, 1, 0 }
   0xb   : > { %s1813_s21 = scalar_select %p1607_p2, 1, 0 }
   0xc   : > { %p1613_p4 = por %p1603_p1, %p52_p0  ;;  %p861_p5 = scmp.ge.s32.totalorder %s1540_s17, 1 }
   0xd   : > { %p1618_p6 = por %p126_p3, %p52_p0  ;;  %p133_p7 = scmp.lt.s32.totalorder %s1540_s17, 3 }
   0xe   : > { %s1814_s22 = scalar_select %p1613_p4, 1, 0 }
   0xf   : > { %s1815_s23 = scalar_select %p1618_p6, 1, 0 }
  0x10   : > { %p1623_p8 = pnand %p861_p5, %p133_p7  ;;  %s1542_s25 = smov [#allocation6]  }
  0x11   : > { %s145_s26 = sshll.u32 %s1542_s25, 4  ;;  %s32_s28 = sadd.s32 1, %s1536_s16  ;;  %s146_s26 = int_to_ptr.vmem [resolvable:$true] %s145_s26 }
  0x12   : > { %s1816_s24 = scalar_select %p1623_p8, 1, 0 }
  0x13   : > { %p1327_p9 = pneg %p1623_p8  ;;  %s1396_s4 = scalar_lea.hbm %s1805_s1, 10240 }
  0x14   : > { %p1397_p12 = scmp.ne.s32.totalorder %s1805_s1, %s1396_s4  ;;  %p1403_p5 = scmp.lt.u32.totalorder %s1396_s4, %s1805_s1 }
  0x15   : > { %p1632_p11 = pnand %p1327_p9, %p1603_p1 }
  0x17   : > { %p1398_p13 = pneg %p1632_p11 }
  0x19   : > { %p1399_p0 = pnand %p1398_p13, %p1397_p12 }
  0x1b   : > { %p1400_p3 = pneg %p1399_p0 }
  0x1d   : > { %p1405_p7 = pnand %p1403_p5, %p1400_p3 }
  0x1f   : > { %1408 = shalt.err (!%p1405_p7)
}
  0x20   : > { %s1409_s9 = scalar_lea.vmem %s146_s26, 10240  ;;  %p1417_p1 = scmp.lt.s32.totalorder %s146_s26, %s146_s26 }
  0x21   : > { %p1410_p9 = scmp.ne.s32.totalorder %s146_s26, %s1409_s9  ;;  %p1418_p4 = scmp.lt.s32.totalorder %s1409_s9, %s1409_s9 }
  0x23   : > { %p1412_p10 = pnand %p1410_p9, %p1398_p13  ;;  %p1419_p8 = por %p1418_p4, %p1417_p1 }
  0x25   : > { %p1413_p6 = pneg %p1412_p10 }
  0x27   : > { %p1420_p2 = pnand %p1419_p8, %p1413_p6 }
  0x29   : > { %1423 = shalt.err (!%p1420_p2)
}
  0x2a   : > { %s1543_s10 = smov 128   ;;  %s1544_s11 = smov 8  }
  0x2b   : > { %1330 = dma.hbm_to_vmem [thread:$0]  (!%p1632_p11), %s1805_s1, 10240, %s146_s26, [#allocation7], %s1543_s10, %s1543_s10, %s1544_s11  }
  0x2c   : > { %p34_p1 = scmp.ge.s32.totalorder %s32_s28, 2  ;;  %s39_s25 = sadd.s32 1, %s1528_s14 }
  0x2d   : > { %p46_p2 = scmp.ne.s32.totalorder %s1528_s14, %s1524_s13  ;;  %p47_p4 = scmp.eq.s32.totalorder %s1540_s17, 0 }
  0x2e   : > { %s1832_s28 = smov (%p34_p1, %s32_s28), 0  ;;  %p1818_p8 = scmp.ne.s32.totalorder %s1813_s21, 0 }
  0x2f   : > { %p48_p6 = por %p47_p4, %p46_p2  ;;  %s36_s27 = ssub.s32 %s1536_s16, %s1832_s28 }
  0x30   : > { %p1664_p10 = por %p1818_p8, %p46_p2  ;;  %p1340_p12 = scmp.lt.s32.totalorder %s1540_s17, 2 }
  0x31   : > { %p37_p13 = scmp.eq.s32.totalorder %s36_s27, 0  ;;  %s162_s30 = sand.u32 1, %s1528_s14  }
  0x32   : > { %s1316_s4 = smul.u32 24, %s162_s30  ;;  %p1676_p11 = pnand %p1340_p12, %p48_p6 }
  0x33   : > { %s1673_s5 = scalar_select %p37_p13, %s1528_s14, %s39_s25  }
  0x34   : > { %s1317_s26 = smul.u32 384, %s1536_s16  ;;  %s166_s6 = scalar_lea.vmem [#allocation3], %s1316_s4 }
  0x35   : > { %s173_s7 = sshll.u32 %s166_s6, 4  ;;  %s1687_s19 = scalar_lea.sflag [#allocation4], %s162_s30  ;;  %s1685_s7 = int_to_ptr.vmem [resolvable:$true] %s173_s7 }
  0x36   : > { %s1683_s18 = scalar_lea.hbm %s1804_s0, %s1317_s26  ;;  %p1426_p3 = pneg %p1676_p11 }
  0x37   : > { %s1424_s25 = scalar_lea.hbm %s1683_s18, 384  ;;  %s1429_s26 = scalar_lea.hbm %s1804_s0, 768 }
  0x38   : > { %p1425_p0 = scmp.ne.s32.totalorder %s1683_s18, %s1424_s25  ;;  %p1430_p9 = scmp.lt.u32.totalorder %s1683_s18, %s1804_s0 }
  0x39   : > { %p1431_p1 = scmp.lt.u32.totalorder %s1429_s26, %s1424_s25  ;;  %p1433_p4 = scmp.lt.u32.totalorder %s1424_s25, %s1683_s18 }
  0x3a   : > { %p1427_p5 = pnand %p1426_p3, %p1425_p0 }
  0x3b   : > { %p1432_p2 = por %p1431_p1, %p1430_p9 }
  0x3c   : > { %p1428_p7 = pneg %p1427_p5 }
  0x3d   : > { %p1434_p6 = por %p1433_p4, %p1432_p2 }
  0x3f   : > { %p1435_p8 = pnand %p1434_p6, %p1428_p7 }
  0x41   : > { %1438 = shalt.err (!%p1435_p8)
}
  0x42   : > { %s1439_s30 = scalar_lea.vmem %s1685_s7, 384  ;;  %s1545_s21 = smov [#allocation3]  }
  0x43   : > { %p1440_p12 = scmp.ne.s32.totalorder %s1685_s7, %s1439_s30  ;;  %s1444_s27 = sshll.u32 %s1545_s21, 4  ;;  %s1445_s27 = int_to_ptr.vmem [resolvable:$false] %s1444_s27 }
  0x44   : > { %s1446_s4 = scalar_lea.vmem %s1445_s27, 768  ;;  %p1447_p5 = scmp.lt.s32.totalorder %s1685_s7, %s1445_s27 }
  0x45   : > { %p1442_p13 = pnand %p1440_p12, %p1426_p3  ;;  %p1448_p9 = scmp.lt.s32.totalorder %s1446_s4, %s1439_s30 }
  0x47   : > { %p1443_p0 = pneg %p1442_p13  ;;  %p1449_p1 = por %p1448_p9, %p1447_p5 }
  0x49   : > { %p1450_p2 = pnand %p1449_p1, %p1443_p0 }
  0x4b   : > { %1453 = shalt.err (!%p1450_p2)
}
  0x4c   : > { %1334 = dma.hbm_to_vmem [thread:$0]  (!%p1676_p11), %s1683_s18, 384, %s1685_s7, %s1687_s19, %s1543_s10, %s1543_s10, %s1544_s11  }
  0x4d   : > { %p1821_p3 = scmp.ne.s32.totalorder %s1816_s24, 0 }
  0x4e   : > { %s1721_s25 = sand.u32 (!%p1821_p3), 1, %s1524_s13   ;;  %p1822_p7 = scmp.ne.s32.totalorder (!%p1821_p3), %s1814_s22, 0 }
  0x4f   : > { %185 = sbr.rel (%p1821_p3) target bundleno = 424 (0x1a8), region = 32  ;;  %s188_s6 = scalar_lea.sflag (!%p1821_p3), [#allocation4], %s1721_s25 }
  0x50   : > { %s1318_s26 = smul.u32 (!%p1821_p3), 24, %s1721_s25 }
  0x52   : > { %s1725_s9 = scalar_lea.vmem (!%p1821_p3), [#allocation3], %s1318_s26 }
  0x56   : > { %1507 = dma.done.wait (%p1822_p7), %s188_s6, 384  }
  0x57   : > { %1509 = vsyncadd (%p1822_p7), %s188_s6, 4294966912  ;;  %p1823_p11 = scmp.ne.s32.totalorder %s1812_s20, 0 }
  0x59   : > { %1511 = dma.done.wait (%p1823_p11), [#allocation7], 10240  }
  0x5a   : > { %1513 = vsyncadd (%p1823_p11), [#allocation7], 4294957056  ;;  %v223_v0 = vld [vmem:[#allocation6] sm:$0xff]  ;;  %v224_v1 = vld [vmem:[#allocation6 + $0x8] sm:$0xff]  ;;  %s867_s20 = sshll.u32 %s1721_s25, 4  ;;  %s882_s7 = sshll.u32 %s1532_s15, 8 }
  0x5b   : > { %v421_v2 = vld [vmem:[#allocation6 + $0x100] sm:$0xff]  ;;  %v1148_v3 = vpack.c.bf16 %v224_v1, %v223_v0  ;;  %v422_v4 = vld [vmem:[#allocation6 + $0x108] sm:$0xff]  ;;  %v225_v5 = vld [vmem:[#allocation6 + $0x10] sm:$0xff]  ;;  %s217_s10 = scalar_lea.vmem [#allocation8], %s867_s20  ;;  %s1755_s19 = scalar_lea.hbm %s1807_s3, %s882_s7 }
  0x5c   : > { %v226_v6 = vld [vmem:[#allocation6 + $0x18] sm:$0xff]  ;;  %v1212_v7 = vpack.c.bf16 %v422_v4, %v421_v2  ;;  %v423_v9 = vld [vmem:[#allocation6 + $0x110] sm:$0xff]  ;;  %v227_v11 = vld [vmem:[#allocation6 + $0x20] sm:$0xff]  ;;  %s751_s11 = sshll.u32 %s217_s10, 4  ;;  %s736_s30 = scalar_lea.sflag [#allocation5], %s1721_s25  ;;  %s1750_s11 = int_to_ptr.vmem [resolvable:$true] %s751_s11 }
  0x5d   : > { %v1152_v8 = vpack.c.bf16 %v226_v6, %v225_v5  ;;  %v424_v10 = vld [vmem:[#allocation6 + $0x118] sm:$0xff]  ;;  %1149 = vmatprep.subr.bf16.mxu1 %v1148_v3  ;;  %v228_v13 = vld [vmem:[#allocation6 + $0x28] sm:$0xff]  ;;  %v425_v14 = vld [vmem:[#allocation6 + $0x120] sm:$0xff]  ;;  %s1454_s21 = scalar_lea.vmem %s1750_s11, 256  ;;  %s1546_s15 = smov [#allocation8]  }
  0x5e   : > { %v1216_v12 = vpack.c.bf16 %v424_v10, %v423_v9  ;;  %v426_v15 = vld [vmem:[#allocation6 + $0x128] sm:$0xff]  ;;  %1213 = vmatprep.subr.bf16.mxu0 %v1212_v7  ;;  %1151 = vmatpush3.bf16.msra.mxu1 %v1148_v3  ;;  %v1156_v16 = vpack.c.bf16 %v228_v13, %v227_v11  ;;  %v229_v18 = vld [vmem:[#allocation6 + $0x30] sm:$0xff]  ;;  %v230_v19 = vld [vmem:[#allocation6 + $0x38] sm:$0xff]  ;;  %p1455_p4 = scmp.ne.s32.totalorder %s1750_s11, %s1454_s21  ;;  %s1458_s27 = sshll.u32 %s1546_s15, 4  ;;  %s1459_s27 = int_to_ptr.vmem [resolvable:$false] %s1458_s27 }
  0x5f   : > { %1215 = vmatpush3.bf16.msra.mxu0 %v1212_v7  ;;  %1153 = vmatprep.subr.bf16.mxu1 %v1152_v8  ;;  %v1220_v17 = vpack.c.bf16 %v426_v15, %v425_v14  ;;  %v427_v20 = vld [vmem:[#allocation6 + $0x130] sm:$0xff]  ;;  %v428_v21 = vld [vmem:[#allocation6 + $0x138] sm:$0xff]  ;;  %v1160_v22 = vpack.c.bf16 %v230_v19, %v229_v18  ;;  %v231_v24 = vld [vmem:[#allocation6 + $0x40] sm:$0xff]  ;;  %s1460_s4 = scalar_lea.vmem %s1459_s27, 512  ;;  %p1461_p12 = scmp.lt.s32.totalorder %s1750_s11, %s1459_s27 }
  0x60   : > { %1217 = vmatprep.subr.bf16.mxu0 %v1216_v12  ;;  %v1224_v23 = vpack.c.bf16 %v428_v21, %v427_v20  ;;  %v232_v25 = vld [vmem:[#allocation6 + $0x48] sm:$0xff]  ;;  %v429_v27 = vld [vmem:[#allocation6 + $0x140] sm:$0xff]  ;;  %v233_v32 = vld [vmem:[#allocation6 + $0x50] sm:$0xff]  ;;  %p1456_p6 = pnand %p1455_p4, %p1664_p10  ;;  %p1462_p13 = scmp.lt.s32.totalorder %s1460_s4, %s1454_s21 }
  0x61   : > { %v221_v26 = vld [vmem:[%s1725_s9] sm:$0xff]  ;;  %v1164_v30 = vpack.c.bf16 %v232_v25, %v231_v24  ;;  %v234_v33 = vld [vmem:[#allocation6 + $0x58] sm:$0xff]  ;;  %v235_v38 = vld [vmem:[#allocation6 + $0x60] sm:$0xff] }
  0x62   : > { %1155 = vmatpush3.bf16.msra.mxu1 %v1152_v8  ;;  %v430_v28 = vld [vmem:[#allocation6 + $0x148] sm:$0xff]  ;;  %1005 = vmatprep.mubr.f32.mxu1 %v221_v26  ;;  %v431_v34 = vld [vmem:[#allocation6 + $0x150] sm:$0xff]  ;;  %v432_v35 = vld [vmem:[#allocation6 + $0x158] sm:$0xff]  ;;  %v1168_v36 = vpack.c.bf16 %v234_v33, %v233_v32  ;;  %p1457_p8 = pneg %p1456_p6  ;;  %p1463_p0 = por %p1462_p13, %p1461_p12 }
  0x63   : > { %1219 = vmatpush3.bf16.msra.mxu0 %v1216_v12  ;;  %1157 = vmatprep.subr.bf16.mxu1 %v1156_v16  ;;  %v870_v29 = vld [vmem:[%s1725_s9 + $0x2] sm:$0xff]  ;;  %v1228_v31 = vpack.c.bf16 %v430_v28, %v429_v27  ;;  %v1232_v37 = vpack.c.bf16 %v432_v35, %v431_v34  ;;  %v433_v40 = vld [vmem:[#allocation6 + $0x160] sm:$0xff] }
  0x64   : > { %1221 = vmatprep.subr.bf16.mxu0 %v1220_v17  ;;  %1075 = vmatprep.mubr.f32.mxu0 %v870_v29  ;;  %v236_v39 = vld [vmem:[#allocation6 + $0x68] sm:$0xff]  ;;  %v237_v44 = vld [vmem:[#allocation6 + $0x70] sm:$0xff]  ;;  %v238_v45 = vld [vmem:[#allocation6 + $0x78] sm:$0xff]  ;;  %p1464_p5 = pnand %p1463_p0, %p1457_p8 }
  0x65   : > { %v434_v41 = vld [vmem:[#allocation6 + $0x168] sm:$0xff]  ;;  %v1172_v42 = vpack.c.bf16 %v236_v39, %v235_v38  ;;  %v435_v46 = vld [vmem:[#allocation6 + $0x170] sm:$0xff]  ;;  %v436_v47 = vld [vmem:[#allocation6 + $0x178] sm:$0xff]  ;;  %v1176_v48 = vpack.c.bf16 %v238_v45, %v237_v44 }
  0x66   : > { %1159 = vmatpush3.bf16.msra.mxu1 %v1156_v16  ;;  %v1236_v43 = vpack.c.bf16 %v434_v41, %v433_v40  ;;  %v1240_v49 = vpack.c.bf16 %v436_v47, %v435_v46  ;;  %v320_v50 = vld [vmem:[#allocation6 + $0x80] sm:$0xff]  ;;  %v321_v51 = vld [vmem:[#allocation6 + $0x88] sm:$0xff]  ;;  %v322_v56 = vld [vmem:[#allocation6 + $0x90] sm:$0xff] }
  0x67   : > { %1223 = vmatpush3.bf16.msra.mxu0 %v1220_v17  ;;  %1161 = vmatprep.subr.bf16.mxu1 %v1160_v22  ;;  %v522_v52 = vld [vmem:[#allocation6 + $0x180] sm:$0xff]  ;;  %v523_v53 = vld [vmem:[#allocation6 + $0x188] sm:$0xff]  ;;  %v1180_v54 = vpack.c.bf16 %v321_v51, %v320_v50  ;;  %v323_v57 = vld [vmem:[#allocation6 + $0x98] sm:$0xff] }
  0x68   : > { %1225 = vmatprep.subr.bf16.mxu0 %v1224_v23  ;;  %v1244_v55 = vpack.c.bf16 %v523_v53, %v522_v52  ;;  %v524_v58 = vld [vmem:[#allocation6 + $0x190] sm:$0xff]  ;;  %v525_v59 = vld [vmem:[#allocation6 + $0x198] sm:$0xff]  ;;  %v1184_v62 = vpack.c.bf16 %v323_v57, %v322_v56  ;;  %v324_v0 = vld [vmem:[#allocation6 + $0xa0] sm:$0xff] }
  0x69   : > { %v222_v60 = vld [vmem:[%s1725_s9 + $0x8] sm:$0xff]  ;;  %v1248_v63 = vpack.c.bf16 %v525_v59, %v524_v58  ;;  %v325_v1 = vld [vmem:[#allocation6 + $0xa8] sm:$0xff]  ;;  %v526_v2 = vld [vmem:[#allocation6 + $0x1a0] sm:$0xff] }
  0x6a   : > { %1163 = vmatpush3.bf16.msra.mxu1 %v1160_v22  ;;  %v871_v61 = vld [vmem:[%s1725_s9 + $0xa] sm:$0xff]  ;;  %v527_v3 = vld [vmem:[#allocation6 + $0x1a8] sm:$0xff]  ;;  %v1188_v6 = vpack.c.bf16 %v325_v1, %v324_v0 }
  0x6b   : > { %1227 = vmatpush3.bf16.msra.mxu0 %v1224_v23  ;;  %1165 = vmatprep.subr.bf16.mxu1 %v1164_v30  ;;  %v868_v4 = vld [vmem:[%s1725_s9 + $0x1] sm:$0xff]  ;;  %v1252_v7 = vpack.c.bf16 %v527_v3, %v526_v2  ;;  %v328_v14 = vld [vmem:[#allocation6 + $0xc0] sm:$0xff] }
  0x6c   : > { %1229 = vmatprep.subr.bf16.mxu0 %v1228_v31  ;;  %v872_v5 = vld [vmem:[%s1725_s9 + $0x3] sm:$0xff]  ;;  %v530_v16 = vld [vmem:[#allocation6 + $0x1c0] sm:$0xff] }
  0x6d   : > { %v326_v8 = vld [vmem:[#allocation6 + $0xb0] sm:$0xff]  ;;  %v327_v9 = vld [vmem:[#allocation6 + $0xb8] sm:$0xff]  ;;  %v329_v15 = vld [vmem:[#allocation6 + $0xc8] sm:$0xff] }
  0x6e   : > { %1167 = vmatpush3.bf16.msra.mxu1 %v1164_v30  ;;  %v528_v10 = vld [vmem:[#allocation6 + $0x1b0] sm:$0xff]  ;;  %v529_v11 = vld [vmem:[#allocation6 + $0x1b8] sm:$0xff]  ;;  %v1192_v12 = vpack.c.bf16 %v327_v9, %v326_v8  ;;  %v531_v17 = vld [vmem:[#allocation6 + $0x1c8] sm:$0xff]  ;;  %v1196_v18 = vpack.c.bf16 %v329_v15, %v328_v14 }
  0x6f   : > { %1231 = vmatpush3.bf16.msra.mxu0 %v1228_v31  ;;  %1169 = vmatprep.subr.bf16.mxu1 %v1168_v36  ;;  %v1256_v13 = vpack.c.bf16 %v529_v11, %v528_v10  ;;  %v1260_v19 = vpack.c.bf16 %v531_v17, %v530_v16  ;;  %v330_v20 = vld [vmem:[#allocation6 + $0xd0] sm:$0xff]  ;;  %v331_v21 = vld [vmem:[#allocation6 + $0xd8] sm:$0xff]  ;;  %v332_v26 = vld [vmem:[#allocation6 + $0xe0] sm:$0xff] }
  0x70   : > { %1233 = vmatprep.subr.bf16.mxu0 %v1232_v37  ;;  %v532_v22 = vld [vmem:[#allocation6 + $0x1d0] sm:$0xff]  ;;  %v533_v23 = vld [vmem:[#allocation6 + $0x1d8] sm:$0xff]  ;;  %v1200_v24 = vpack.c.bf16 %v331_v21, %v330_v20  ;;  %v333_v27 = vld [vmem:[#allocation6 + $0xe8] sm:$0xff] }
  0x71   : > { %v1264_v25 = vpack.c.bf16 %v533_v23, %v532_v22  ;;  %v534_v28 = vld [vmem:[#allocation6 + $0x1e0] sm:$0xff]  ;;  %v535_v29 = vld [vmem:[#allocation6 + $0x1e8] sm:$0xff]  ;;  %v1204_v30 = vpack.c.bf16 %v333_v27, %v332_v26  ;;  %v334_v32 = vld [vmem:[#allocation6 + $0xf0] sm:$0xff] }
  0x72   : > { %1171 = vmatpush3.bf16.msra.mxu1 %v1168_v36  ;;  %v1268_v31 = vpack.c.bf16 %v535_v29, %v534_v28  ;;  %v335_v33 = vld [vmem:[#allocation6 + $0xf8] sm:$0xff]  ;;  %v536_v34 = vld [vmem:[#allocation6 + $0x1f0] sm:$0xff]  ;;  %v623_v38 = vld [vmem:[#allocation6 + $0x200] sm:$0xff] }
  0x73   : > { %1235 = vmatpush3.bf16.msra.mxu0 %v1232_v37  ;;  %1173 = vmatprep.subr.bf16.mxu1 %v1172_v42  ;;  %v537_v35 = vld [vmem:[#allocation6 + $0x1f8] sm:$0xff]  ;;  %v1208_v36 = vpack.c.bf16 %v335_v33, %v334_v32  ;;  %v624_v39 = vld [vmem:[#allocation6 + $0x208] sm:$0xff]  ;;  %v625_v41 = vld [vmem:[#allocation6 + $0x210] sm:$0xff] }
  0x74   : > { %1237 = vmatprep.subr.bf16.mxu0 %v1236_v43  ;;  %v1272_v37 = vpack.c.bf16 %v537_v35, %v536_v34  ;;  %v1276_v40 = vpack.c.bf16 %v624_v39, %v623_v38  ;;  %v873_v44 = vld [vmem:[%s1725_s9 + $0xb] sm:$0xff] }
  0x75   : > { %v874_v46 = vld [vmem:[%s1725_s9 + $0x4] sm:$0xff]  ;;  %v627_v47 = vld [vmem:[#allocation6 + $0x220] sm:$0xff] }
  0x76   : > { %1175 = vmatpush3.bf16.msra.mxu1 %v1172_v42  ;;  %v626_v42 = vld [vmem:[#allocation6 + $0x218] sm:$0xff]  ;;  %v629_v50 = vld [vmem:[#allocation6 + $0x230] sm:$0xff]  ;;  %v631_v53 = vld [vmem:[#allocation6 + $0x240] sm:$0xff] }
  0x77   : > { %1239 = vmatpush3.bf16.msra.mxu0 %v1236_v43  ;;  %1177 = vmatprep.subr.bf16.mxu1 %v1176_v48  ;;  %v869_v43 = vld [vmem:[%s1725_s9 + $0x9] sm:$0xff]  ;;  %v1280_v45 = vpack.c.bf16 %v626_v42, %v625_v41 }
  0x78   : > { %1241 = vmatprep.subr.bf16.mxu0 %v1240_v49  ;;  %v630_v51 = vld [vmem:[#allocation6 + $0x238] sm:$0xff]  ;;  %v633_v56 = vld [vmem:[#allocation6 + $0x250] sm:$0xff]  ;;  %v635_v59 = vld [vmem:[#allocation6 + $0x260] sm:$0xff] }
  0x79   : > { %v1288_v52 = vpack.c.bf16 %v630_v51, %v629_v50  ;;  %v634_v57 = vld [vmem:[#allocation6 + $0x258] sm:$0xff] }
  0x7a   : > { %1179 = vmatpush3.bf16.msra.mxu1 %v1176_v48  ;;  %v628_v48 = vld [vmem:[#allocation6 + $0x228] sm:$0xff]  ;;  %v1296_v58 = vpack.c.bf16 %v634_v57, %v633_v56  ;;  %v875_v1 = vld [vmem:[%s1725_s9 + $0xc] sm:$0xff] }
  0x7b   : > { %1243 = vmatpush3.bf16.msra.mxu0 %v1240_v49  ;;  %1181 = vmatprep.subr.bf16.mxu1 %v1180_v54  ;;  %v1284_v49 = vpack.c.bf16 %v628_v48, %v627_v47 }
  0x7c   : > { %1245 = vmatprep.subr.bf16.mxu0 %v1244_v55 }
  0x7d   : > { %1006 = vmatmul.mubr.f32.vlgmr.msra.gmra.mrb[0].mxu1 %v222_v60  ;;  %v636_v60 = vld [vmem:[#allocation6 + $0x268] sm:$0xff] }
  0x7e   : > { %1183 = vmatpush3.bf16.msra.mxu1 %v1180_v54  ;;  %1076 = vmatmul.mubr.f32.vlgmr.msra.gmra.mrb[0].mxu0 %v871_v61  ;;  %v632_v54 = vld [vmem:[#allocation6 + $0x248] sm:$0xff]  ;;  %v1300_v61 = vpack.c.bf16 %v636_v60, %v635_v59 }
  0x7f   : > { %1247 = vmatpush3.bf16.msra.mxu0 %v1244_v55  ;;  %1185 = vmatprep.subr.bf16.mxu1 %v1184_v62  ;;  %v1292_v55 = vpack.c.bf16 %v632_v54, %v631_v53 }
  0x80   : > { %1249 = vmatprep.subr.bf16.mxu0 %v1248_v63  ;;  %1040 = vmatprep.mubr.f32.mxu1 %v868_v4 }
  0x81   : > { %1110 = vmatprep.mubr.f32.mxu0 %v872_v5  ;;  %v876_v5 = vld [vmem:[%s1806_s2] ss:$0 sm:$0xff] }
  0x82   : > { %1187 = vmatpush3.bf16.msra.mxu1 %v1184_v62  ;;  %v637_v62 = vld [vmem:[#allocation6 + $0x270] sm:$0xff] }
  0x83   : > { %1251 = vmatpush3.bf16.msra.mxu0 %v1248_v63  ;;  %1189 = vmatprep.subr.bf16.mxu1 %v1188_v6  ;;  %v638_v63 = vld [vmem:[#allocation6 + $0x278] sm:$0xff] }
  0x84   : > { %1253 = vmatprep.subr.bf16.mxu0 %v1252_v7  ;;  %v1304_v0 = vpack.c.bf16 %v638_v63, %v637_v62 }
  0x86   : > { %1191 = vmatpush3.bf16.msra.mxu1 %v1188_v6 }
  0x87   : > { %1255 = vmatpush3.bf16.msra.mxu0 %v1252_v7  ;;  %1193 = vmatprep.subr.bf16.mxu1 %v1192_v12 }
  0x88   : > { %1257 = vmatprep.subr.bf16.mxu0 %v1256_v13 }
  0x8a   : > { %1195 = vmatpush3.bf16.msra.mxu1 %v1192_v12 }
  0x8b   : > { %1259 = vmatpush3.bf16.msra.mxu0 %v1256_v13  ;;  %1197 = vmatprep.subr.bf16.mxu1 %v1196_v18 }
  0x8c   : > { %1261 = vmatprep.subr.bf16.mxu0 %v1260_v19 }
  0x8e   : > { %1199 = vmatpush3.bf16.msra.mxu1 %v1196_v18 }
  0x8f   : > { %1263 = vmatpush3.bf16.msra.mxu0 %v1260_v19  ;;  %1201 = vmatprep.subr.bf16.mxu1 %v1200_v24 }
  0x90   : > { %1265 = vmatprep.subr.bf16.mxu0 %v1264_v25 }
  0x92   : > { %1203 = vmatpush3.bf16.msra.mxu1 %v1200_v24 }
  0x93   : > { %1267 = vmatpush3.bf16.msra.mxu0 %v1264_v25  ;;  %1205 = vmatprep.subr.bf16.mxu1 %v1204_v30 }
  0x94   : > { %1269 = vmatprep.subr.bf16.mxu0 %v1268_v31 }
  0x96   : > { %1207 = vmatpush3.bf16.msra.mxu1 %v1204_v30 }
  0x97   : > { %1271 = vmatpush3.bf16.msra.mxu0 %v1268_v31  ;;  %1209 = vmatprep.subr.bf16.mxu1 %v1208_v36 }
  0x98   : > { %1273 = vmatprep.subr.bf16.mxu0 %v1272_v37 }
  0x9a   : > { %1211 = vmatpush3.bf16.msra.mxu1 %v1208_v36 }
  0x9b   : > { %1275 = vmatpush3.bf16.msra.mxu0 %v1272_v37 }
  0x9c   : > { %1277 = vmatprep.subr.bf16.mxu0 %v1276_v40 }
  0x9d   : > { %1041 = vmatmul.mubr.f32.vlgmr.msra.gmra.mrb[0].mxu1 %v869_v43 }
  0x9e   : > { %1111 = vmatmul.mubr.f32.vlgmr.msra.gmra.mrb[0].mxu0 %v873_v44 }
  0x9f   : > { %1279 = vmatpush3.bf16.msra.mxu0 %v1276_v40  ;;  %1145 = vmatprep.mubr.f32.mxu0 %v874_v46 }
  0xa0   : > { %1281 = vmatprep.subr.bf16.mxu0 %v1280_v45 }
  0xa3   : > { %1283 = vmatpush3.bf16.msra.mxu0 %v1280_v45 }
  0xa4   : > { %1285 = vmatprep.subr.bf16.mxu0 %v1284_v49 }
  0xa7   : > { %1287 = vmatpush3.bf16.msra.mxu0 %v1284_v49 }
  0xa8   : > { %1289 = vmatprep.subr.bf16.mxu0 %v1288_v52 }
  0xab   : > { %1291 = vmatpush3.bf16.msra.mxu0 %v1288_v52 }
  0xac   : > { %1293 = vmatprep.subr.bf16.mxu0 %v1292_v55 }
  0xaf   : > { %1295 = vmatpush3.bf16.msra.mxu0 %v1292_v55 }
  0xb0   : > { %1297 = vmatprep.subr.bf16.mxu0 %v1296_v58 }
  0xb3   : > { %1299 = vmatpush3.bf16.msra.mxu0 %v1296_v58 }
  0xb4   : > { %1301 = vmatprep.subr.bf16.mxu0 %v1300_v61 }
  0xb7   : > { %1303 = vmatpush3.bf16.msra.mxu0 %v1300_v61 }
  0xb8   : > { %1305 = vmatprep.subr.bf16.mxu0 %v1304_v0 }
  0xbb   : > { %1307 = vmatpush3.bf16.msra.mxu0 %v1304_v0 }
  0xbe   : > { %1146 = vmatmul.mubr.f32.vlgmr.msra.gmra.mrb[0].mxu0 %v875_v1 }
 0x170   : > { %v1042_v2 = vpop.f32.mrb[0].mxu1 }
 0x171   : > { %v402_v3 = vpop.f32.mrb[1].mxu1 }
 0x191   : > { %v1147_v4 = vpop.f32.mrb[0].mxu0 }
 0x192   : > { %v1308_v6 = vadd.f32 %v1147_v4, %v1042_v2  ;;  %v705_v7 = vpop.f32.mrb[1].mxu0 }
 0x193   : > { %v1309_v8 = vadd.f32 %v705_v7, %v402_v3 }
 0x194   : > { %v730_v9 = vadd.f32 %v1308_v6, %v876_v5 }
 0x195   : > { %v729_v10 = vadd.f32 %v1309_v8, %v876_v5 }
 0x196   : > { %v732_v11 = vmax.f32 %v730_v9, 0.0 }
 0x197   : > { %v731_v12 = vmax.f32 %v729_v10, 0.0 }
 0x198   : > { %734 = vst [vmem:[%s217_s10 + $0x8] sm:$0xff] %v732_v11 }
 0x199   : > { %733 = vst [vmem:[%s217_s10] sm:$0xff] %v731_v12 }
 0x19a   : > { %1467 = shalt.err (!%p1464_p5)
}
 0x19b   : > { %s1468_s26 = scalar_lea.hbm %s1755_s19, 256  ;;  %s1472_s20 = scalar_lea.hbm %s1807_s3, 512 }
 0x19c   : > { %p1469_p9 = scmp.ne.s32.totalorder %s1755_s19, %s1468_s26  ;;  %p1473_p3 = scmp.lt.u32.totalorder %s1755_s19, %s1807_s3 }
 0x19d   : > { %p1474_p7 = scmp.lt.u32.totalorder %s1472_s20, %s1468_s26  ;;  %p1476_p4 = scmp.lt.u32.totalorder %s1468_s26, %s1755_s19 }
 0x19e   : > { %p1470_p1 = pnand %p1469_p9, %p1664_p10 }
 0x19f   : > { %p1475_p11 = por %p1474_p7, %p1473_p3 }
 0x1a0   : > { %p1471_p2 = pneg %p1470_p1 }
 0x1a1   : > { %p1477_p6 = por %p1476_p4, %p1475_p11 }
 0x1a3   : > { %p1478_p8 = pnand %p1477_p6, %p1471_p2 }
 0x1a5   : > { %1481 = shalt.err (!%p1478_p8)
}
 0x1a6   : > { %s1547_s10 = smov 128   ;;  %s1548_s7 = smov 8  }
 0x1a7   : > { %1325 = dma.vmem_to_hbm [thread:$0]  (%p1664_p10), %s1750_s11, 256, %s1755_s19, %s736_s30, %s1547_s10, %s1547_s10, %s1548_s7  }
 0x1a8 PF: > { %s766_s8 = sand.u32 1, %s1520_s12   ;;  %p1824_p12 = scmp.ne.s32.totalorder %s1815_s23, 0 }
 0x1a9   : > { %p1825_p13 = scmp.ge.s32.totalorder %s1540_s17, 2  ;;  %s767_s18 = scalar_lea.sflag [#allocation5], %s766_s8 }
 0x1ab   : > { %p1336_p0 = pnand %p1825_p13, %p1824_p12 }
 0x1ad   : > { %1515 = dma.done.wait (!%p1336_p0), %s767_s18, 256  }
 0x1ae   : > { %1517 = vsyncadd (!%p1336_p0), %s767_s18, 4294967040  ;;  %s20_s17 = sadd.s32 1, %s1540_s17   ;;  %s1826_s12 = smov %s1524_s13 }
 0x1af   : > { %p17_p5 = scmp.ge.s32.totalorder %s20_s17, 4   ;;  %s1827_s13 = smov %s1528_s14 }
 0x1b0   : > { %s1828_s14 = smov %s1673_s5  ;;  %s1829_s15 = smov %s1536_s16 }
 0x1b1   : > { %s1830_s16 = smov %s1832_s28  ;;  %19 = sbr.rel (!%p17_p5) target bundleno = 7 (0x7), region = 86 }
 0x1b8   :  { %772 = vsyncpa [#allocation4], 1 }
 0x1b9   :  { %774 = vsyncpa [#allocation4 + $0x1], 1 }
 0x1ba   :  { %775 = vsyncpa [#allocation7], 1 }
 0x1bb   :  { %776 = vsyncpa [#allocation5], 1 }
 0x1bc   :  { %778 = vsyncpa [#allocation5 + $0x1], 1 }

</bundles_post_ra>
